<compile_context>
chip_gen: v7x
topology: tpu7x:2x2x1
jax: 0.10.0
libtpu: 0.0.40
codegen_flags: <defaults>
</compile_context>

<pallas_src>
import functools

import jax
import jax.numpy as jnp
from jax import lax
from jax.experimental import pallas as pl
from jax.experimental.pallas import tpu as pltpu

NEG_INF = -1e30  # finite stand-in for log(0); exp() underflows to 0, never NaN.


def _round_up(x: int, m: int) -> int:
    return (x + m - 1) // m * m


def _footprint_bytes(tb: int, tn: int, d: int, p: int) -> int:
    """Rough per-step VMEM footprint: double-buffered streams + live temporaries."""
    stream = 2 * (d * tn * 2 + tb * d * 2 + tn * 4 + tn * 4)    # vt, u, vsq, idx_c
    rows = 2 * tb * (4 * 4 + (p + 1) * 4) + 2 * tb * 4          # scale/abst/diag/out, hits
    temps = 6 * tb * tn * 4                                     # uv/logits/mask/s/exp ...
    return stream + rows + temps + (1 << 20)


def _pick_tiles(B, N, D, P, tile_b, tile_n):
    try:
        vmem = int(pltpu.get_tpu_info().vmem_capacity_bytes)
    except Exception:
        vmem = 64 << 20
    # Heuristic: <96 MiB VMEM per core => v7x-like (64 MiB/TC, 2 TensorCores).
    small_vmem = vmem < (96 << 20)
    budget = (38 << 20) if small_vmem else (80 << 20)

    if tile_b is not None:
        tb = _round_up(int(tile_b), 16)
    elif small_vmem and B > 32:
        # Guarantee >= 2 row tiles so the 'parallel' B axis spans both TensorCores.
        tb = min(256, _round_up(-(-B // 2), 16))
    else:
        tb = 256

    if tile_n is not None:
        tn = _round_up(int(tile_n), 128)
    else:
        tn = 256
        cap = 2048 if small_vmem else 4096
        for cand in (512, 1024, 2048, 4096):
            if cand <= cap and _footprint_bytes(tb, cand, D, P) <= budget:
                tn = cand

    fp = _footprint_bytes(tb, tn, D, P)
    vmem_limit = max(32 << 20, min(fp + (16 << 20), budget + (12 << 20)))
    return tb, tn, int(vmem_limit)


def _infonce_kernel(u_ref, vt_ref, vsqh_ref, scale_ref, abst_ref, hit_ref,
                    idxc_ref, diag_ref, out_ref, m_sc, l_sc,
                    *, n_valid, mask_cols, tb, tn):
    """One (B-tile, N-tile) step of the online-logsumexp InfoNCE loss."""
    kn = pl.program_id(1)

    @pl.when(kn == 0)
    def _():
        m_sc[...] = jnp.full_like(m_sc, NEG_INF)
        l_sc[...] = jnp.zeros_like(l_sc)

    # bf16 MXU matmul with f32 accumulation; the 0.5*||u||^2 row term is dropped
    # (constant per row, cancels in lse_i - logits[i,i]).
    uv = jnp.dot(u_ref[...], vt_ref[...],
                 preferred_element_type=jnp.float32)               # (TB, TN) f32
    logits = (uv - vsqh_ref[...]) * scale_ref[...]                 # 2 VALU ops/elem

    # Accidental-hit mask: row item id + P positive ids vs column item ids.
    idx_c = idxc_ref[...]                                          # (1, TN) i32
    hits = hit_ref[...]                                            # (TB, P+1) i32
    acc = hits[:, 0:1] == idx_c
    for p_i in range(1, hits.shape[1]):                            # static, small
        acc = jnp.logical_or(acc, hits[:, p_i:p_i + 1] == idx_c)
    s = jnp.where(acc, jnp.float32(NEG_INF), logits)

    # Padded columns only exist in the last N tile — gate the mask there.
    if mask_cols:
        def _mask_pad(x):
            col = kn * tn + lax.broadcasted_iota(jnp.int32, (1, tn), 1)
            return jnp.where(col < n_valid, x, jnp.float32(NEG_INF))
        s = lax.cond(kn == pl.num_programs(1) - 1, _mask_pad, lambda x: x, s)

    # Force the EXACT f32 diagonal logit back in (the eye in the reference) —
    # only on tiles the diagonal band actually crosses.
    row0 = pl.program_id(0) * tb

    def _force_diag(x):
        row_g = row0 + lax.broadcasted_iota(jnp.int32, (tb, 1), 0)
        col_g = kn * tn + lax.broadcasted_iota(jnp.int32, (1, tn), 1)
        return jnp.where(row_g == col_g, diag_ref[...], x)

    on_diag = jnp.logical_and(row0 < (kn + 1) * tn, kn * tn < row0 + tb)
    s = lax.cond(on_diag, _force_diag, lambda x: x, s)

    # Online (flash-style) logsumexp across the N tiles.  NEG_INF bookkeeping is
    # load-bearing (see header); do not shrink |NEG_INF| or reorder the rescale.
    m_prev = m_sc[...]
    m_new = jnp.maximum(m_prev, jnp.max(s, axis=1, keepdims=True))
    l_sc[...] = (jnp.exp(m_prev - m_new) * l_sc[...]
                 + jnp.sum(jnp.exp(s - m_new), axis=1, keepdims=True))
    m_sc[...] = m_new

    @pl.when(kn == pl.num_programs(1) - 1)
    def _():
        lse = m_sc[...] + jnp.log(l_sc[...])                       # (TB, 1)
        # cross_entropy(row i, class i) = lse_i - logits[i, i] (exact f32 diag)
        out_ref[...] = (lse - diag_ref[...]) * abst_ref[...]


def embedding_infonce_loss(user_embed, item_embed, target, item_idx, pos_idx,
                           *, sigma=1.0, tile_b=None, tile_n=None):
    B, D = user_embed.shape
    N, D2 = item_embed.shape
    assert D2 == D and target.shape[0] == B and N >= B
    P = pos_idx.shape[1]

    TB, TN, vmem_limit = _pick_tiles(B, N, D, P, tile_b, tile_n)
    TB = TB if B > TB else _round_up(B, 16)
    TN = TN if N > TN else N                 # block == full dim when N is small
    B_pad = _round_up(B, TB)
    N_pad = _round_up(N, TN)
    nb, nk = B_pad // TB, N_pad // TN

    u32 = user_embed.astype(jnp.float32)
    v32 = item_embed.astype(jnp.float32)
    tgt = target.astype(jnp.float32)

    # Hoisted f32 terms.  0.5*||u||^2 is omitted entirely (cancels exactly).
    vsq_half = 0.5 * jnp.sum(v32 * v32, axis=1)[None, :]                # (1, N)
    scale = jnp.sign(tgt)[:, None] * jnp.float32(sigma)                 # (B, 1)
    abst = jnp.abs(tgt)[:, None]                                        # (B, 1)
    diag = (jnp.sum(u32 * v32[:B], axis=1, keepdims=True)
            - 0.5 * jnp.sum(v32[:B] * v32[:B], axis=1, keepdims=True)) * scale

    # Streaming matmul operands in bf16; item_embed pre-transposed (lane-dense RHS).
    u_b16 = u32.astype(jnp.bfloat16)
    vt_b16 = v32.T.astype(jnp.bfloat16)                                 # (D, N)

    idx_c = item_idx.astype(jnp.int32)[None, :]                         # (1, N)
    hit_idx = jnp.concatenate(
        [item_idx[:B].astype(jnp.int32)[:, None], pos_idx.astype(jnp.int32)],
        axis=1)                                                         # (B, P+1)

    pad_b, pad_n = B_pad - B, N_pad - N
    if pad_b:
        u_b16 = jnp.pad(u_b16, ((0, pad_b), (0, 0)))
        scale = jnp.pad(scale, ((0, pad_b), (0, 0)))    # sign->0: neutral logits
        abst = jnp.pad(abst, ((0, pad_b), (0, 0)))      # |t| = 0 -> zero weight
        diag = jnp.pad(diag, ((0, pad_b), (0, 0)))
        hit_idx = jnp.pad(hit_idx, ((0, pad_b), (0, 0)), constant_values=-1)
    if pad_n:
        vt_b16 = jnp.pad(vt_b16, ((0, 0), (0, pad_n)))
        vsq_half = jnp.pad(vsq_half, ((0, 0), (0, pad_n)))
        idx_c = jnp.pad(idx_c, ((0, 0), (0, pad_n)),
                        constant_values=jnp.iinfo(jnp.int32).min)

    row_map = lambda bi, kn: (bi, 0)
    col_map = lambda bi, kn: (0, kn)

    kernel = functools.partial(_infonce_kernel, n_valid=N,
                               mask_cols=bool(pad_n), tb=TB, tn=TN)
    out = pl.pallas_call(
        kernel,
        out_shape=jax.ShapeDtypeStruct((B_pad, 1), jnp.float32),
        grid_spec=pltpu.PrefetchScalarGridSpec(
            num_scalar_prefetch=0,
            grid=(nb, nk),
            in_specs=[
                pl.BlockSpec((TB, D), row_map),        # user_embed        bf16
                pl.BlockSpec((D, TN), col_map),        # item_embed^T      bf16
                pl.BlockSpec((1, TN), col_map),        # 0.5*||v||^2       f32
                pl.BlockSpec((TB, 1), row_map),        # sign(t)*sigma     f32
                pl.BlockSpec((TB, 1), row_map),        # |t|               f32
                pl.BlockSpec((TB, P + 1), row_map),    # [item_idx, pos]   i32
                pl.BlockSpec((1, TN), col_map),        # item_idx (cols)   i32
                pl.BlockSpec((TB, 1), row_map),        # exact diag logit  f32
            ],
            out_specs=pl.BlockSpec((TB, 1), row_map),
            scratch_shapes=[pltpu.VMEM((TB, 1), jnp.float32),   # running max m
                            pltpu.VMEM((TB, 1), jnp.float32)],  # running sum l
        ),
        compiler_params=pltpu.CompilerParams(
            dimension_semantics=("parallel", "arbitrary"),
            vmem_limit_bytes=vmem_limit,
        ),
    )(u_b16, vt_b16, vsq_half, scale, abst, hit_idx, idx_c, diag)

    return jnp.sum(out[:B, 0])


def _reference_loss(u, v, t, item_idx, pos_idx, sigma=1.0):
    """Pure-JAX port of EmbeddingLoss.infonce_loss (num_negatives=None)."""
    B, N = u.shape[0], v.shape[0]
    d2 = 0.5 * jnp.sum((u[:, None, :] - v[None, :, :]) ** 2, axis=-1)
    logits = -d2 * jnp.sign(t)[:, None] * sigma
    acc = item_idx[:B, None] == item_idx[None, :]
    acc = acc | jnp.any(pos_idx[:, None, :] == item_idx[None, :, None], axis=-1)
    neg = (~acc) | jnp.eye(B, N, dtype=bool)
    masked = jnp.where(neg, logits, NEG_INF)
    lse = jax.scipy.special.logsumexp(masked, axis=-1)
    diag = jnp.diagonal(logits)
    return jnp.sum((lse - diag) * jnp.abs(t))


if __name__ == "__main__":
    key = jax.random.PRNGKey(0)
    k1, k2, k3, k4, k5 = jax.random.split(key, 5)

    # Small module-shaped case: single tile.
    B, N, D, P = 8, 16, 32, 4
    user_embed = jax.random.normal(k1, (B, D), dtype=jnp.float32)
    item_embed = jax.random.normal(k2, (N, D), dtype=jnp.float32)
    target = jax.random.normal(k3, (B,), dtype=jnp.float32)
    item_idx = jax.random.randint(k4, (N,), 0, 50, dtype=jnp.int32)
    pos_idx = jax.random.randint(k5, (B, P), 0, 50, dtype=jnp.int32)

    out = embedding_infonce_loss(user_embed, item_embed, target, item_idx, pos_idx)
    out = jax.block_until_ready(out)
    ref = _reference_loss(user_embed, item_embed, target, item_idx, pos_idx)
    assert jnp.allclose(out, ref, rtol=2e-2, atol=1e-1), (out, ref)

    # Multi-tile case: exercises the (parallel B, arbitrary N) grid, online
    # logsumexp across N tiles, gated eye/padding masks, row/col padding paths.
    B2, N2 = 24, 200
    k6, k7, k8, k9, k10 = jax.random.split(jax.random.PRNGKey(1), 5)
    user2 = jax.random.normal(k6, (B2, D), dtype=jnp.float32)
    item2 = jax.random.normal(k7, (N2, D), dtype=jnp.float32)
    target2 = jax.random.normal(k8, (B2,), dtype=jnp.float32)
    item_idx2 = jax.random.randint(k9, (N2,), 0, 64, dtype=jnp.int32)
    pos_idx2 = jax.random.randint(k10, (B2, P), 0, 64, dtype=jnp.int32)

    out2 = embedding_infonce_loss(user2, item2, target2, item_idx2, pos_idx2,
                                  tile_b=16, tile_n=128)
    out2 = jax.block_until_ready(out2)
    ref2 = _reference_loss(user2, item2, target2, item_idx2, pos_idx2)
    assert jnp.allclose(out2, ref2, rtol=2e-2, atol=1e-1), (out2, ref2)

    print("KERNEL_OK")
</pallas_src>

<mosaic_0001>
module attributes {stable_mosaic.version = 11 : i64} {
  func.func @_infonce_kernel(%arg0: i32, %arg1: i32, %arg2: memref<16x32xbf16, #tpu.memory_space<vmem>>, %arg3: memref<32x16xbf16, #tpu.memory_space<vmem>>, %arg4: memref<1x16xf32, #tpu.memory_space<vmem>>, %arg5: memref<16x1xf32, #tpu.memory_space<vmem>>, %arg6: memref<16x1xf32, #tpu.memory_space<vmem>>, %arg7: memref<16x5xi32, #tpu.memory_space<vmem>>, %arg8: memref<1x16xi32, #tpu.memory_space<vmem>>, %arg9: memref<16x1xf32, #tpu.memory_space<vmem>>, %arg10: memref<16x1xf32, #tpu.memory_space<vmem>>, %arg11: memref<16x1xf32, #tpu.memory_space<vmem>>, %arg12: memref<16x1xf32, #tpu.memory_space<vmem>>) attributes {dimension_semantics = [#tpu.dimension_semantics<parallel>, #tpu.dimension_semantics<arbitrary>], iteration_bounds = array<i64: 1, 1>, scalar_prefetch = 0 : i64, scratch_operands = 2 : i64, tpu.core_type = #tpu.core_type<tc>, window_params = [{transform_indices = @transform_0, window_bounds = array<i64: 16, 32>}, {transform_indices = @transform_1, window_bounds = array<i64: 32, 16>}, {transform_indices = @transform_2, window_bounds = array<i64: 1, 16>}, {transform_indices = @transform_3, window_bounds = array<i64: 16, 1>}, {transform_indices = @transform_4, window_bounds = array<i64: 16, 1>}, {transform_indices = @transform_5, window_bounds = array<i64: 16, 5>}, {transform_indices = @transform_6, window_bounds = array<i64: 1, 16>}, {transform_indices = @transform_7, window_bounds = array<i64: 16, 1>}, {transform_indices = @transform_8, window_bounds = array<i64: 16, 1>}]} {
    %c0_i32 = arith.constant 0 : i32
    %0 = arith.cmpi eq, %arg1, %c0_i32 : i32
    %1 = arith.extui %0 : i1 to i32
    %c0_i32_0 = arith.constant 0 : i32
    %2 = arith.cmpi ne, %1, %c0_i32_0 : i32
    scf.if %2 {
      %cst_29 = arith.constant -1.000000e+30 : f32
      %70 = vector.broadcast %cst_29 : f32 to vector<16x1xf32>
      %c0_30 = arith.constant 0 : index
      %c0_31 = arith.constant 0 : index
      %71 = vector.load %arg11[%c0_30, %c0_31] : memref<16x1xf32, #tpu.memory_space<vmem>>, vector<16x1xf32>
      tpu.vector_store %arg11[%c0_30, %c0_31], %70 {strides = array<i32>} : memref<16x1xf32, #tpu.memory_space<vmem>>, vector<16x1xf32>,
      %cst_32 = arith.constant 0.000000e+00 : f32
      %72 = vector.broadcast %cst_32 : f32 to vector<16x1xf32>
      %c0_33 = arith.constant 0 : index
      %c0_34 = arith.constant 0 : index
      %73 = vector.load %arg12[%c0_33, %c0_34] : memref<16x1xf32, #tpu.memory_space<vmem>>, vector<16x1xf32>
      tpu.vector_store %arg12[%c0_33, %c0_34], %72 {strides = array<i32>} : memref<16x1xf32, #tpu.memory_space<vmem>>, vector<16x1xf32>,
    } else {
    }
    %c0 = arith.constant 0 : index
    %c0_1 = arith.constant 0 : index
    %3 = vector.load %arg2[%c0, %c0_1] : memref<16x32xbf16, #tpu.memory_space<vmem>>, vector<16x32xbf16>
    %c0_2 = arith.constant 0 : index
    %c0_3 = arith.constant 0 : index
    %4 = vector.load %arg3[%c0_2, %c0_3] : memref<32x16xbf16, #tpu.memory_space<vmem>>, vector<32x16xbf16>
    %cst = arith.constant dense<0.000000e+00> : vector<16x16xf32>
    %5 = tpu.matmul %3, %4, %cst {dimension_numbers = #tpu.dot_dimension_numbers<[1], [0], [0], [1], [0, 0, 1, 1], [], []>} : vector<16x32xbf16>, vector<32x16xbf16>, vector<16x16xf32> -> vector<16x16xf32>
    %c0_4 = arith.constant 0 : index
    %c0_5 = arith.constant 0 : index
    %6 = vector.load %arg4[%c0_4, %c0_5] : memref<1x16xf32, #tpu.memory_space<vmem>>, vector<1x16xf32>
    %7 = vector.broadcast %6 : vector<1x16xf32> to vector<16x16xf32>
    %8 = arith.subf %5, %7 : vector<16x16xf32>
    %c0_6 = arith.constant 0 : index
    %c0_7 = arith.constant 0 : index
    %9 = vector.load %arg5[%c0_6, %c0_7] : memref<16x1xf32, #tpu.memory_space<vmem>>, vector<16x1xf32>
    %10 = vector.broadcast %9 : vector<16x1xf32> to vector<16x16xf32>
    %11 = arith.mulf %8, %10 : vector<16x16xf32>
    %c0_8 = arith.constant 0 : index
    %c0_9 = arith.constant 0 : index
    %12 = vector.load %arg8[%c0_8, %c0_9] : memref<1x16xi32, #tpu.memory_space<vmem>>, vector<1x16xi32>
    %c0_10 = arith.constant 0 : index
    %c0_11 = arith.constant 0 : index
    %13 = vector.load %arg7[%c0_10, %c0_11] : memref<16x5xi32, #tpu.memory_space<vmem>>, vector<16x5xi32>
    %14 = vector.extract_strided_slice %13 {offsets = [0, 0], sizes = [16, 1], strides = [1, 1]} : vector<16x5xi32> to vector<16x1xi32>
    %15 = vector.broadcast %14 : vector<16x1xi32> to vector<16x16xi32>
    %16 = vector.broadcast %12 : vector<1x16xi32> to vector<16x16xi32>
    %17 = arith.cmpi eq, %15, %16 : vector<16x16xi32>
    %18 = vector.extract_strided_slice %13 {offsets = [0, 1], sizes = [16, 1], strides = [1, 1]} : vector<16x5xi32> to vector<16x1xi32>
    %19 = vector.broadcast %18 : vector<16x1xi32> to vector<16x16xi32>
    %20 = vector.broadcast %12 : vector<1x16xi32> to vector<16x16xi32>
    %21 = arith.cmpi eq, %19, %20 : vector<16x16xi32>
    %22 = arith.ori %17, %21 : vector<16x16xi1>
    %23 = vector.extract_strided_slice %13 {offsets = [0, 2], sizes = [16, 1], strides = [1, 1]} : vector<16x5xi32> to vector<16x1xi32>
    %24 = vector.broadcast %23 : vector<16x1xi32> to vector<16x16xi32>
    %25 = vector.broadcast %12 : vector<1x16xi32> to vector<16x16xi32>
    %26 = arith.cmpi eq, %24, %25 : vector<16x16xi32>
    %27 = arith.ori %22, %26 : vector<16x16xi1>
    %28 = vector.extract_strided_slice %13 {offsets = [0, 3], sizes = [16, 1], strides = [1, 1]} : vector<16x5xi32> to vector<16x1xi32>
    %29 = vector.broadcast %28 : vector<16x1xi32> to vector<16x16xi32>
    %30 = vector.broadcast %12 : vector<1x16xi32> to vector<16x16xi32>
    %31 = arith.cmpi eq, %29, %30 : vector<16x16xi32>
    %32 = arith.ori %27, %31 : vector<16x16xi1>
    %33 = vector.extract_strided_slice %13 {offsets = [0, 4], sizes = [16, 1], strides = [1, 1]} : vector<16x5xi32> to vector<16x1xi32>
    %34 = vector.broadcast %33 : vector<16x1xi32> to vector<16x16xi32>
    %35 = vector.broadcast %12 : vector<1x16xi32> to vector<16x16xi32>
    %36 = arith.cmpi eq, %34, %35 : vector<16x16xi32>
    %37 = arith.ori %32, %36 : vector<16x16xi1>
    %cst_12 = arith.constant -1.000000e+30 : f32
    %38 = vector.broadcast %cst_12 : f32 to vector<16x16xf32>
    %39 = arith.select %37, %38, %11 : vector<16x16xi1>, vector<16x16xf32>
    %c16_i32 = arith.constant 16 : i32
    %40 = arith.muli %arg0, %c16_i32 : i32
    %c1_i32 = arith.constant 1 : i32
    %41 = arith.addi %arg1, %c1_i32 : i32
    %c16_i32_13 = arith.constant 16 : i32
    %42 = arith.muli %41, %c16_i32_13 : i32
    %43 = arith.cmpi slt, %40, %42 : i32
    %c16_i32_14 = arith.constant 16 : i32
    %44 = arith.muli %arg1, %c16_i32_14 : i32
    %c16_i32_15 = arith.constant 16 : i32
    %45 = arith.addi %40, %c16_i32_15 : i32
    %46 = arith.cmpi slt, %44, %45 : i32
    %47 = arith.andi %43, %46 : i1
    %48 = arith.extui %47 : i1 to i32
    %c0_i32_16 = arith.constant 0 : i32
    %49 = arith.cmpi ne, %48, %c0_i32_16 : i32
    %50 = scf.if %49 -> (vector<16x16xf32>) {
      %70 = tpu.iota {dimensions = array<i32: 0>} : vector<16x1xi32>
      %71 = vector.broadcast %40 : i32 to vector<16x1xi32>
      %72 = arith.addi %71, %70 : vector<16x1xi32>
      %c16_i32_29 = arith.constant 16 : i32
      %73 = arith.muli %arg1, %c16_i32_29 : i32
      %74 = tpu.iota {dimensions = array<i32: 1>} : vector<1x16xi32>
      %75 = vector.broadcast %73 : i32 to vector<1x16xi32>
      %76 = arith.addi %75, %74 : vector<1x16xi32>
      %77 = vector.broadcast %72 : vector<16x1xi32> to vector<16x16xi32>
      %78 = vector.broadcast %76 : vector<1x16xi32> to vector<16x16xi32>
      %79 = arith.cmpi eq, %77, %78 : vector<16x16xi32>
      %c0_30 = arith.constant 0 : index
      %c0_31 = arith.constant 0 : index
      %80 = vector.load %arg9[%c0_30, %c0_31] : memref<16x1xf32, #tpu.memory_space<vmem>>, vector<16x1xf32>
      %81 = vector.shape_cast %80 : vector<16x1xf32> to vector<16x1xf32>
      %82 = vector.broadcast %81 : vector<16x1xf32> to vector<16x16xf32>
      %83 = arith.select %79, %82, %39 : vector<16x16xi1>, vector<16x16xf32>
      scf.yield %83 : vector<16x16xf32>
    } else {
      scf.yield %39 : vector<16x16xf32>
    }
    %c0_17 = arith.constant 0 : index
    %c0_18 = arith.constant 0 : index
    %51 = vector.load %arg11[%c0_17, %c0_18] : memref<16x1xf32, #tpu.memory_space<vmem>>, vector<16x1xf32>
    %cst_19 = arith.constant dense<0xFF800000> : vector<16xf32>
    %52 = vector.multi_reduction <maximumf>, %50, %cst_19 [1] : vector<16x16xf32> to vector<16xf32>
    %53 = vector.shape_cast %52 : vector<16xf32> to vector<16x1xf32>
    %54 = arith.maximumf %51, %53 : vector<16x1xf32>
    %55 = arith.subf %51, %54 : vector<16x1xf32>
    %56 = math.exp %55 : vector<16x1xf32>
    %c0_20 = arith.constant 0 : index
    %c0_21 = arith.constant 0 : index
    %57 = vector.load %arg12[%c0_20, %c0_21] : memref<16x1xf32, #tpu.memory_space<vmem>>, vector<16x1xf32>
    %58 = arith.mulf %56, %57 : vector<16x1xf32>
    %59 = vector.broadcast %54 : vector<16x1xf32> to vector<16x16xf32>
    %60 = arith.subf %50, %59 : vector<16x16xf32>
    %61 = math.exp %60 : vector<16x16xf32>
    %cst_22 = arith.constant dense<0.000000e+00> : vector<16xf32>
    %62 = vector.multi_reduction <add>, %61, %cst_22 [1] : vector<16x16xf32> to vector<16xf32>
    %63 = vector.shape_cast %62 : vector<16xf32> to vector<16x1xf32>
    %64 = arith.addf %58, %63 : vector<16x1xf32>
    %c0_23 = arith.constant 0 : index
    %c0_24 = arith.constant 0 : index
    %65 = vector.load %arg12[%c0_23, %c0_24] : memref<16x1xf32, #tpu.memory_space<vmem>>, vector<16x1xf32>
    tpu.vector_store %arg12[%c0_23, %c0_24], %64 {strides = array<i32>} : memref<16x1xf32, #tpu.memory_space<vmem>>, vector<16x1xf32>,
    %c0_25 = arith.constant 0 : index
    %c0_26 = arith.constant 0 : index
    %66 = vector.load %arg11[%c0_25, %c0_26] : memref<16x1xf32, #tpu.memory_space<vmem>>, vector<16x1xf32>
    tpu.vector_store %arg11[%c0_25, %c0_26], %54 {strides = array<i32>} : memref<16x1xf32, #tpu.memory_space<vmem>>, vector<16x1xf32>,
    %c0_i32_27 = arith.constant 0 : i32
    %67 = arith.cmpi eq, %arg1, %c0_i32_27 : i32
    %68 = arith.extui %67 : i1 to i32
    %c0_i32_28 = arith.constant 0 : i32
    %69 = arith.cmpi ne, %68, %c0_i32_28 : i32
    scf.if %69 {
      %c0_29 = arith.constant 0 : index
      %c0_30 = arith.constant 0 : index
      %70 = vector.load %arg11[%c0_29, %c0_30] : memref<16x1xf32, #tpu.memory_space<vmem>>, vector<16x1xf32>
      %c0_31 = arith.constant 0 : index
      %c0_32 = arith.constant 0 : index
      %71 = vector.load %arg12[%c0_31, %c0_32] : memref<16x1xf32, #tpu.memory_space<vmem>>, vector<16x1xf32>
      %72 = math.log %71 : vector<16x1xf32>
      %73 = arith.addf %70, %72 : vector<16x1xf32>
      %c0_33 = arith.constant 0 : index
      %c0_34 = arith.constant 0 : index
      %74 = vector.load %arg9[%c0_33, %c0_34] : memref<16x1xf32, #tpu.memory_space<vmem>>, vector<16x1xf32>
      %75 = arith.subf %73, %74 : vector<16x1xf32>
      %c0_35 = arith.constant 0 : index
      %c0_36 = arith.constant 0 : index
      %76 = vector.load %arg6[%c0_35, %c0_36] : memref<16x1xf32, #tpu.memory_space<vmem>>, vector<16x1xf32>
      %77 = arith.mulf %75, %76 : vector<16x1xf32>
      %c0_37 = arith.constant 0 : index
      %c0_38 = arith.constant 0 : index
      %78 = vector.load %arg10[%c0_37, %c0_38] : memref<16x1xf32, #tpu.memory_space<vmem>>, vector<16x1xf32>
      tpu.vector_store %arg10[%c0_37, %c0_38], %77 {strides = array<i32>} : memref<16x1xf32, #tpu.memory_space<vmem>>, vector<16x1xf32>,
    } else {
    }
    return
  }
  func.func @transform_0(%arg0: i32, %arg1: i32) -> (i32, i32) {
    %c0_i32 = arith.constant 0 : i32
    %c0_i32_0 = arith.constant 0 : i32
    return %arg0, %c0_i32 : i32, i32
  }
  func.func @transform_1(%arg0: i32, %arg1: i32) -> (i32, i32) {
    %c0_i32 = arith.constant 0 : i32
    %c0_i32_0 = arith.constant 0 : i32
    return %c0_i32, %arg1 : i32, i32
  }
  func.func @transform_2(%arg0: i32, %arg1: i32) -> (i32, i32) {
    %c0_i32 = arith.constant 0 : i32
    %c0_i32_0 = arith.constant 0 : i32
    return %c0_i32, %arg1 : i32, i32
  }
  func.func @transform_3(%arg0: i32, %arg1: i32) -> (i32, i32) {
    %c0_i32 = arith.constant 0 : i32
    %c0_i32_0 = arith.constant 0 : i32
    return %arg0, %c0_i32 : i32, i32
  }
  func.func @transform_4(%arg0: i32, %arg1: i32) -> (i32, i32) {
    %c0_i32 = arith.constant 0 : i32
    %c0_i32_0 = arith.constant 0 : i32
    return %arg0, %c0_i32 : i32, i32
  }
  func.func @transform_5(%arg0: i32, %arg1: i32) -> (i32, i32) {
    %c0_i32 = arith.constant 0 : i32
    %c0_i32_0 = arith.constant 0 : i32
    return %arg0, %c0_i32 : i32, i32
  }
  func.func @transform_6(%arg0: i32, %arg1: i32) -> (i32, i32) {
    %c0_i32 = arith.constant 0 : i32
    %c0_i32_0 = arith.constant 0 : i32
    return %c0_i32, %arg1 : i32, i32
  }
  func.func @transform_7(%arg0: i32, %arg1: i32) -> (i32, i32) {
    %c0_i32 = arith.constant 0 : i32
    %c0_i32_0 = arith.constant 0 : i32
    return %arg0, %c0_i32 : i32, i32
  }
  func.func @transform_8(%arg0: i32, %arg1: i32) -> (i32, i32) {
    %c0_i32 = arith.constant 0 : i32
    %c0_i32_0 = arith.constant 0 : i32
    return %arg0, %c0_i32 : i32, i32
  }
}

</mosaic_0001>

<bundles_post_ra>
// kernel: tpu_custom_call.1
= control target key start
LH: loop header
LB: loop body
LE: loop exit
PB: predicated region body
PF: predicated region fallthrough
CT: control target
= control target key end

     0   :  { %v359_v0 = vmov 0.0   ;;  %vm360_vm0 = vmmov 0   ;;  %v361_v2 = vmov 1   ;;  %v362_v3 = vmov 0   ;;  %s479_s1 = inlined_call_operand.vmem [shape: bf16[32,16], index: 1, kind: input, shape index: {}]   ;;  %s480_s5 = inlined_call_operand.vmem [shape: s32[16,5], index: 5, kind: input, shape index: {}]   ;;  %s481_s0 = inlined_call_operand.vmem [shape: bf16[16,32], index: 0, kind: input, shape index: {}]   ;;  %s482_s3 = inlined_call_operand.vmem [shape: f32[16,1], index: 3, kind: input, shape index: {}]   ;;  %s483_s7 = inlined_call_operand.vmem [shape: f32[16,1], index: 7, kind: input, shape index: {}]   ;;  %s484_s6 = inlined_call_operand.vmem [shape: s32[1,16], index: 6, kind: input, shape index: {}]   ;;  %s485_s2 = inlined_call_operand.vmem [shape: f32[1,16], index: 2, kind: input, shape index: {}]   ;;  %s486_s4 = inlined_call_operand.vmem [shape: f32[16,1], index: 4, kind: input, shape index: {}]   ;;  %s487_s8 = inlined_call_operand.vmem [shape: f32[16,1], index: 8, kind: output, shape index: {}]  }
   0x1   :  { %317 = vmatprep.subr.bf16.mxu0 %v359_v0  ;;  %v344_v1 = vld [vmem:[%s479_s1] sm:$0xff]   ;;  %321 = vmatprep.mubr.msk.bf16.mxu0 %vm360_vm0, %v359_v0  ;;  %v345_v4 = vld [vmem:[%s479_s1 + $0x8] sm:$0xff]   ;;  %vm62_vm1 = vcmask 261120   ;;  %v363_v8 = vmov 2   ;;  %v364_v9 = vmov 3   ;;  %v365_v11 = vmov 4  }
   0x2   :  { %334 = vset.pattern.permute.xlu1 %v361_v2  ;;  %333 = vset.pattern.permute.xlu0 %v362_v3  ;;  %v131_v5 = vld [vmem:[%s480_s5] sm:$0xff]  ;;  %v132_v7 = vld [vmem:[%s480_s5 + $0x8] sm:$0xff]  ;;  %vm34_vm2 = vcmask 7168   ;;  %v366_v15 = vmov -1e+30   ;;  %v198_v27 = vlaneseq }
   0x3   :  { %318 = vmatpush3.bf16.msra.mxu0 %v344_v1  ;;  %146 = vperm.xlu1 %334, %v131_v5   ;;  %v346_v6 = vld [vmem:[%s481_s0] sm:$0xff]   ;;  %v117_v12 = vld [vmem:[%s482_s3 + $0x8] sm:$0xff]  ;;  %35 = vst.msk [vmem:[#allocation2] sm:$0xff] %vm34_vm2, %v366_v15  ;;  %36 = vst.msk [vmem:[#allocation2 + $0x8] sm:$0xff] %vm34_vm2, %v366_v15 }
   0x4   :  { %319 = vmatprep.subr.bf16.mxu0 %v359_v0  ;;  %134 = vperm.xlu0 %333, %v131_v5   ;;  %v116_v10 = vld [vmem:[%s482_s3] sm:$0xff]  ;;  %v436_v13 = vld [vmem:[%s483_s7 + $0x8] sm:$0xff]  ;;  %37 = vst.msk [vmem:[#allocation3] sm:$0xff] %vm34_vm2, %v359_v0  ;;  %38 = vst.msk [vmem:[#allocation3 + $0x8] sm:$0xff] %vm34_vm2, %v359_v0  ;;  %v199_v28 = vshrl.u32 %v198_v27, 7  ;;  %v205_v32 = vand.u32 127, %v198_v27 }
   0x5   :  { %v442_v14 = vld [vmem:[%s483_s7] sm:$0xff] }
   0x6   :  { %v313_v24 = vld [vmem:[%s484_s6] ss:$0 sm:$0xff]  ;;  %v200_v36 = vadd.s32 8, %v199_v28 }
   0x7   :  { %320 = vmatpush3.bf16.msra.mxu0 %v345_v4  ;;  %149 = vperm.xlu1 %334, %v132_v7   ;;  %v312_v30 = vld [vmem:[%s485_s2] ss:$0 sm:$0xff] }
   0x8   :  { %137 = vperm.xlu0 %333, %v132_v7   ;;  %v298_v27 = vld [vmem:[%s486_s4] sm:$0xff] }
   0xa   :  { %322 = vmatmul.mubr.msk.bf16.vlgmr.msra.gmra.mrb[0].mxu0 %vm62_vm1, %v346_v6  ;;  %v231_v50 = vld [vmem:[#allocation2] sm:$0xff]  ;;  %v232_v52 = vld [vmem:[#allocation2 + $0x8] sm:$0xff] }
   0xb   :  { %336 = vset.pattern.permute.xlu1 %v363_v8 }
   0xc   :  { %335 = vset.pattern.permute.xlu0 %v363_v8  ;;  %159 = vperm.xlu1 %336, %v132_v7  }
   0xd   :  { %156 = vperm.xlu0 %335, %v131_v5  }
  0x10   :  { %337 = vset.pattern.permute.xlu1 %v364_v9 }
  0x11   :  { %338 = vset.pattern.permute.xlu0 %v364_v9  ;;  %166 = vperm.xlu1 %337, %v131_v5   ;;  %v249_v9 = vld [vmem:[#allocation3 + $0x8] sm:$0xff] }
  0x12   :  { %169 = vperm.xlu0 %338, %v132_v7  }
  0x15   :  { %339 = vset.pattern.permute.xlu1 %v362_v3 }
  0x16   :  { %340 = vset.pattern.permute.xlu0 %v365_v11  ;;  %120 = vperm.xlu1 %339, %v116_v10  }
  0x17   :  { %176 = vperm.xlu0 %340, %v131_v5  }
  0x1a   :  { %125 = vperm.xlu1 %339, %v117_v12  }
  0x1b   :  { %343 = vset.pattern.permute.xlu0 %v362_v3 }
  0x1c   :  { %219 = vperm.xlu0 %343, %v436_v13  }
  0x1e   :  { %341 = vset.pattern.permute.xlu1 %v365_v11 }
  0x1f   :  { %179 = vperm.xlu1 %341, %v132_v7   ;;  %v248_v7 = vld [vmem:[#allocation3] sm:$0xff] }
  0x23   :  { %342 = vset.pattern.permute.xlu1 %v362_v3 }
  0x24   :  { %214 = vperm.xlu1 %342, %v442_v14  }
  0x82   :  { %v147_v16 = vpop.permute.xlu1 %146 }
  0x83   :  { %v135_v18 = vpop.permute.xlu0 %134  ;;  %vm151_vm3 = vcmp.eq.s32.totalorder %v147_v16, %v313_v24 }
  0x84   :  { %vm143_vm4 = vcmp.eq.s32.totalorder %v135_v18, %v313_v24 }
  0x85   :  { %vm153_vm7 = vmor %vm143_vm4, %vm151_vm3  ;;  %vm208_vm4 = vcmp.eq.s32.totalorder %v199_v28, %v205_v32 }
  0x86   :  { %v150_v17 = vpop.permute.xlu1 %149 }
  0x87   :  { %v138_v20 = vpop.permute.xlu0 %137  ;;  %vm152_vm5 = vcmp.eq.s32.totalorder %v150_v17, %v313_v24 }
  0x88   :  { %vm144_vm6 = vcmp.eq.s32.totalorder %v138_v20, %v313_v24 }
  0x89   :  { %vm154_vm10 = vmor %vm144_vm6, %vm152_vm5  ;;  %vm233_vm6 = vcmask 130048  }
  0x8b   :  { %v160_v19 = vpop.permute.xlu1 %159 }
  0x8c   :  { %v157_v22 = vpop.permute.xlu0 %156  ;;  %vm162_vm9 = vcmp.eq.s32.totalorder %v160_v19, %v313_v24 }
  0x8d   :  { %vm161_vm8 = vcmp.eq.s32.totalorder %v157_v22, %v313_v24  ;;  %vm164_vm13 = vmor %vm154_vm10, %vm162_vm9 }
  0x8e   :  { %vm163_vm12 = vmor %vm153_vm7, %vm161_vm8  ;;  %vm209_vm7 = vcmp.eq.s32.totalorder %v200_v36, %v205_v32 }
  0x90   :  { %v167_v21 = vpop.permute.xlu1 %166 }
  0x91   :  { %v170_v25 = vpop.permute.xlu0 %169  ;;  %vm171_vm11 = vcmp.eq.s32.totalorder %v167_v21, %v313_v24 }
  0x92   :  { %vm172_vm14 = vcmp.eq.s32.totalorder %v170_v25, %v313_v24  ;;  %vm173_vm15 = vmor %vm163_vm12, %vm171_vm11 }
  0x93   :  { %vm174_vm1 = vmor %vm164_vm13, %vm172_vm14 }
  0x95   :  { %v121_v23 = vpop.permute.xlu1 %120 }
  0x96   :  { %v177_v29 = vpop.permute.xlu0 %176 }
  0x97   :  { %vm181_vm0 = vcmp.eq.s32.totalorder %v177_v29, %v313_v24 }
  0x98   :  { %vm183_vm5 = vmor %vm173_vm15, %vm181_vm0 }
  0x99   :  { %v126_v26 = vpop.permute.xlu1 %125 }
  0x9b   :  { %v220_v43 = vpop.permute.xlu0 %219 }
  0x9e   :  { %v180_v31 = vpop.permute.xlu1 %179 }
  0x9f   :  { %vm182_vm3 = vcmp.eq.s32.totalorder %v180_v31, %v313_v24 }
  0xa0   :  { %vm184_vm8 = vmor %vm174_vm1, %vm182_vm3 }
  0xa3   :  { %v215_v41 = vpop.permute.xlu1 %214 }
  0xdd   :  { %v100_v33 = vpop.f32.mrb[0].mxu0 }
  0xde   :  { %v114_v34 = vsub.f32 %v100_v33, %v312_v30  ;;  %v323_v35 = vpop.f32.mrb[1].mxu0 }
  0xdf   :  { %v103_v37 = vpop.f32.mrb[2].mxu0 }
  0xe0   :  { %v128_v38 = vmul.f32 %v121_v23, %v114_v34  ;;  %v115_v39 = vsub.f32 %v103_v37, %v312_v30  ;;  %v324_v40 = vpop.f32.mrb[3].mxu0  ;;  %v299_v30 = vld [vmem:[%s486_s4 + $0x8] sm:$0xff] }
  0xe2   :  { %v129_v42 = vmul.f32 %v126_v26, %v115_v39  ;;  %v185_v44 = vsel %vm183_vm5, -1e+30, %v128_v38 }
  0xe3   :  { %v222_v45 = vsel %vm208_vm4, %v215_v41, %v185_v44 }
  0xe4   :  { %v234_v46 = vsel %vm233_vm6, %v222_v45, -inf  ;;  %v186_v47 = vsel %vm184_vm8, -1e+30, %v129_v42 }
  0xe5   :  { %235 = vmax.xlane.f32.xlu1 %v234_v46  ;;  %v223_v48 = vsel %vm209_vm7, %v220_v43, %v186_v47 }
  0xe6   :  { %v237_v49 = vsel %vm233_vm6, %v223_v48, -inf }
  0xe7   :  { %238 = vmax.xlane.f32.xlu0 %v237_v49 }
 0x172   :  { %v236_v51 = vpop.xlane.xlu1 %235 }
 0x173   :  { %v240_v53 = vmax.f32 %v231_v50, %v236_v51 }
 0x174   :  { %v239_v54 = vpop.xlane.xlu0 %238 }
 0x175   :  { %v242_v55 = vsub.f32 %v231_v50, %v240_v53  ;;  %279 = vst.msk [vmem:[#allocation2] sm:$0xff] %vm34_vm2, %v240_v53  ;;  %v241_v56 = vmax.f32 %v232_v52, %v239_v54  ;;  %254 = vperm.xlu1 %342, %v240_v53  }
 0x177   :  { %v243_v57 = vsub.f32 %v232_v52, %v241_v56  ;;  %280 = vst.msk [vmem:[#allocation2 + $0x8] sm:$0xff] %vm34_vm2, %v241_v56  ;;  %259 = vperm.xlu0 %343, %v241_v56   ;;  %v244_v4 = vmul.f32 1.442695, %v242_v55 }
 0x179   :  { %v246_v5 = vmul.f32 1.442695, %v243_v57 }
 0x17c   :  { %v284_v23 = vld [vmem:[#allocation2] sm:$0xff] }
 0x17e   :  { %v285_v26 = vld [vmem:[#allocation2 + $0x8] sm:$0xff] }
 0x1f4   :  { %v255_v58 = vpop.permute.xlu1 %254 }
 0x1f5   :  { %v262_v59 = vsub.f32 %v222_v45, %v255_v58 }
 0x1f6   :  { %v260_v60 = vpop.permute.xlu0 %259 }
 0x1f7   :  { %v264_v61 = vmul.f32 1.442695, %v262_v59  ;;  %v263_v62 = vsub.f32 %v223_v48, %v260_v60 }
 0x1f9   :  { %347 = vpow2.f32 %v264_v61  ;;  %v266_v63 = vmul.f32 1.442695, %v263_v62 }
 0x1fb   :  { %349 = vpow2.f32 %v266_v63 }
 0x1fc   :  { %351 = vpow2.f32 %v244_v4 }
 0x1fd   :  { %353 = vpow2.f32 %v246_v5 }
 0x203   :  { %v348_v0 = vpop.eup %347 }
 0x204   :  { %v268_v1 = vsel %vm233_vm6, %v348_v0, 0.0 }
 0x205   :  { %v350_v2 = vpop.eup %349  ;;  %269 = vadd.xlane.f32.xlu1 %v268_v1 }
 0x206   :  { %v271_v3 = vsel %vm233_vm6, %v350_v2, 0.0  ;;  %v352_v6 = vpop.eup %351 }
 0x207   :  { %272 = vadd.xlane.f32.xlu0 %v271_v3  ;;  %v354_v8 = vpop.eup %353  ;;  %v250_v10 = vmul.f32 %v352_v6, %v248_v7 }
 0x208   :  { %v251_v15 = vmul.f32 %v354_v8, %v249_v9 }
 0x292   :  { %v270_v11 = vpop.xlane.xlu1 %269 }
 0x293   :  { %v274_v12 = vadd.f32 %v270_v11, %v250_v10 }
 0x294   :  { %v273_v16 = vpop.xlane.xlu0 %272 }
 0x295   :  { %277 = vst.msk [vmem:[#allocation3] sm:$0xff] %vm34_vm2, %v274_v12  ;;  %v275_v17 = vadd.f32 %v273_v16, %v251_v15 }
 0x297   :  { %278 = vst.msk [vmem:[#allocation3 + $0x8] sm:$0xff] %vm34_vm2, %v275_v17 }
 0x29c   :  { %v286_v18 = vld [vmem:[#allocation3] sm:$0xff] }
 0x29d   :  { %355 = vlog2.f32 %v286_v18 }
 0x29e   :  { %v287_v19 = vld [vmem:[#allocation3 + $0x8] sm:$0xff] }
 0x29f   :  { %357 = vlog2.f32 %v287_v19 }
 0x2a7   :  { %v356_v20 = vpop.eup %355 }
 0x2a8   :  { %v289_v21 = vmul.f32 0.6931472, %v356_v20 }
 0x2a9   :  { %v358_v22 = vpop.eup %357 }
 0x2aa   :  { %v292_v24 = vadd.f32 %v289_v21, %v284_v23  ;;  %v291_v25 = vmul.f32 0.6931472, %v358_v22 }
 0x2ac   :  { %v296_v28 = vsub.f32 %v292_v24, %v442_v14  ;;  %v293_v29 = vadd.f32 %v291_v25, %v285_v26 }
 0x2ae   :  { %v300_v31 = vmul.f32 %v298_v27, %v296_v28  ;;  %v297_v32 = vsub.f32 %v293_v29, %v436_v13 }
 0x2b0   :  { %302 = vst.msk [vmem:[%s487_s8] sm:$0xff] %vm34_vm2, %v300_v31  ;;  %v301_v33 = vmul.f32 %v299_v30, %v297_v32 }
 0x2b2   :  { %303 = vst.msk [vmem:[%s487_s8 + $0x8] sm:$0xff] %vm34_vm2, %v301_v33 }

</bundles_post_ra>
